<compile_context>
chip_gen: v6e
topology: v6e:2x2x1
jax: 0.10.0
libtpu: 0.0.40
codegen_flags: <defaults>
</compile_context>

<pallas_src>
import jax
import jax.numpy as jnp
from jax import lax
from jax.experimental import pallas as pl
from jax.experimental.pallas import tpu as pltpu


LAYER_SIZES = [(10, 256), (256, 256), (256, 128), (128, 128), (128, 2)]
OUT_ROWS = 8                       # final layer rows padded to one f32 sublane tile
DEFAULT_TILE_B = 4096              # batch rows per grid step at scale
VMEM_LIMIT_BYTES = 48 * 1024 * 1024  # > v5e's 16 MiB default, < v7x's 64 MiB physical


def _round_up(n, m):
    return ((n + m - 1) // m) * m


def _plan_batch(B, tile_b):
    """Pick (B_pad, eff_tile) for the batch grid.

    * tiny batches (<= 512 rows): one step, block == full array.
    * mid-size batches (<= 2*tile_b): split into >= 2 steps so both v7x
      TensorCores get work (no-op on v5e/v6e).
    * large batches: tile_b rows per step.
    eff_tile is always a multiple of 128 when the grid has > 1 step, so the
    transposed (OUT_ROWS, eff_tile) output block stays lane-aligned.
    """
    B8 = _round_up(B, 8)
    if B8 <= 512:
        return B8, B8
    if B8 <= 2 * tile_b:
        eff = _round_up(-(-B8 // 2), 128)
    else:
        eff = tile_b
    return _round_up(B8, eff), eff


def ann_kernel(x_ref,
               w1_ref, b1_ref,
               w2_ref, b2_ref,
               w3_ref, b3_ref,
               w4_ref, b4_ref,
               w5t_ref, b5_ref,
               o_ref):
    # x tile: (TILE_B, 10) f32.  Hidden weights: bf16, biases f32 (VMEM-resident).
    # Matmul operands are bf16 with f32 accumulation; bias add / ReLU stay f32
    # (v5e VPU has no bf16 path); the result is cast back to bf16 immediately
    # so the live intermediates feeding the next dot are half-width.
    def hidden(h_bf16, w_ref, b_ref):
        y = jnp.dot(h_bf16, w_ref[...], preferred_element_type=jnp.float32)
        y = jnp.maximum(y + b_ref[...], 0.0)
        return y.astype(jnp.bfloat16)

    h = hidden(x_ref[...].astype(jnp.bfloat16), w1_ref, b1_ref)
    h = hidden(h, w2_ref, b2_ref)
    h = hidden(h, w3_ref, b3_ref)
    h = hidden(h, w4_ref, b4_ref)

    # Final layer, computed transposed so the output block is (OUT_ROWS, TILE_B)
    # with batch on the lane axis (lane-dense, tiny HBM writeback):
    #   o_t[n, m] = sum_k w5t[n, k] * h[m, k]    (A @ B^T on the MXU)
    o_t = lax.dot_general(w5t_ref[...], h, (((1,), (1,)), ((), ())),
                          preferred_element_type=jnp.float32)
    o_ref[...] = o_t + b5_ref[...]          # bias (OUT_ROWS, 1) broadcasts on lanes


def prepare_params(params):
    """One-time cast/pad/transpose of the torch-layout params for the kernel.

    params: list of (W (in, out) f32, b (1, out) f32), one per layer.
    Returns (flat_tuple_of_10_arrays, out_dim).
    """
    *hidden_layers, (w5, b5) = params
    prep = []
    for w, b in hidden_layers:
        prep.append(w.astype(jnp.bfloat16))
        prep.append(b.reshape(1, -1).astype(jnp.float32))
    out_dim = w5.shape[1]
    # Final layer stored transposed and row-padded to OUT_ROWS (padded rows are
    # zero -> padded output rows are exactly zero and get sliced off).
    w5t = jnp.pad(w5.T.astype(jnp.bfloat16), ((0, OUT_ROWS - out_dim), (0, 0)))
    b5t = jnp.pad(b5.reshape(-1, 1).astype(jnp.float32),
                  ((0, OUT_ROWS - out_dim), (0, 0)))
    prep.append(w5t)
    prep.append(b5t)
    return tuple(prep), out_dim


def ann_forward(x, prepared, out_dim=2, tile_b=DEFAULT_TILE_B):
    """x: (B, 10) float32; prepared: output of prepare_params().  Returns (B, out_dim) f32."""
    B, F = x.shape
    B_pad, eff_tile = _plan_batch(B, tile_b)
    if B_pad != B:
        x = jnp.pad(x, ((0, B_pad - B), (0, 0)))

    # x is tiled along batch; weights/biases use constant index_maps (stay
    # VMEM-resident across grid steps) and are single-buffered.
    in_specs = [pl.BlockSpec((eff_tile, F), lambda i: (i, 0))]
    for a in prepared:
        in_specs.append(pl.BlockSpec(a.shape, lambda i: (0, 0),
                                     pipeline_mode=pl.Buffered(1)))

    hidden_flops = 2 * sum(fi * fo for fi, fo in LAYER_SIZES[:-1])
    final_flops = 2 * LAYER_SIZES[-1][0] * OUT_ROWS
    flops = B_pad * (hidden_flops + final_flops)
    bytes_accessed = int(4 * B_pad * F + 4 * OUT_ROWS * B_pad
                         + sum(a.size * a.dtype.itemsize for a in prepared))

    out = pl.pallas_call(
        ann_kernel,
        out_shape=jax.ShapeDtypeStruct((OUT_ROWS, B_pad), jnp.float32),
        grid_spec=pltpu.PrefetchScalarGridSpec(
            num_scalar_prefetch=0,
            grid=(B_pad // eff_tile,),
            in_specs=in_specs,
            out_specs=pl.BlockSpec((OUT_ROWS, eff_tile), lambda i: (0, i)),
        ),
        compiler_params=pltpu.CompilerParams(
            dimension_semantics=("parallel",),
            vmem_limit_bytes=VMEM_LIMIT_BYTES),
        cost_estimate=pl.CostEstimate(
            flops=flops, transcendentals=0, bytes_accessed=bytes_accessed),
    )(x, *prepared)

    # Slice the 2 real rows / B real columns and return in (B, out_dim) layout.
    return out[:out_dim, :B].T


def init_params(key):
    """Deterministic init matching the torch Linear shapes (Kaiming-uniform-ish)."""
    params = []
    for fan_in, fan_out in LAYER_SIZES:
        key, kw, kb = jax.random.split(key, 3)
        bound = 1.0 / jnp.sqrt(jnp.float32(fan_in))
        w = jax.random.uniform(kw, (fan_in, fan_out), jnp.float32, -bound, bound)
        b = jax.random.uniform(kb, (1, fan_out), jnp.float32, -bound, bound)
        params.append((w, b))
    return params


def ann_reference(x, params):
    """Pure f32 reference matching the torch module semantics."""
    h = x
    for i, (w, b) in enumerate(params):
        h = h @ w + b
        if i < len(params) - 1:
            h = jnp.maximum(h, 0.0)
    return h


if __name__ == "__main__":
    key = jax.random.PRNGKey(0)
    key, kx1, kx2 = jax.random.split(key, 3)

    params = init_params(key)
    prepared, out_dim = prepare_params(params)   # one-time cast/pad/transpose

    # Small batch, not a multiple of 8: single-step pad-and-slice path.
    x_small = jax.random.normal(kx1, (6, 10), jnp.float32)
    out_small = jax.block_until_ready(ann_forward(x_small, prepared, out_dim))
    ref_small = ann_reference(x_small, params)
    assert out_small.shape == (6, 2), out_small.shape
    # bf16 matmul operands (f32 accumulate) vs pure-f32 reference -> loose tol.
    assert jnp.allclose(out_small, ref_small, atol=2e-2, rtol=2e-2), (
        f"max abs diff = {jnp.max(jnp.abs(out_small - ref_small))}")

    # Mid-size batch: exercises the >= 2-step grid (v7x megacore split) and the
    # ragged pad (1000 -> 1024) with a 512-row tile.
    x_mid = jax.random.normal(kx2, (1000, 10), jnp.float32)
    out_mid = jax.block_until_ready(ann_forward(x_mid, prepared, out_dim))
    ref_mid = ann_reference(x_mid, params)
    assert out_mid.shape == (1000, 2), out_mid.shape
    assert jnp.allclose(out_mid, ref_mid, atol=2e-2, rtol=2e-2), (
        f"max abs diff = {jnp.max(jnp.abs(out_mid - ref_mid))}")

    print("KERNEL_OK")
</pallas_src>

<mosaic_0001>
module attributes {stable_mosaic.version = 11 : i64} {
  func.func @ann_kernel(%arg0: i32, %arg1: memref<8x10xf32, #tpu.memory_space<vmem>>, %arg2: memref<10x256xbf16, #tpu.memory_space<vmem>>, %arg3: memref<1x256xf32, #tpu.memory_space<vmem>>, %arg4: memref<256x256xbf16, #tpu.memory_space<vmem>>, %arg5: memref<1x256xf32, #tpu.memory_space<vmem>>, %arg6: memref<256x128xbf16, #tpu.memory_space<vmem>>, %arg7: memref<1x128xf32, #tpu.memory_space<vmem>>, %arg8: memref<128x128xbf16, #tpu.memory_space<vmem>>, %arg9: memref<1x128xf32, #tpu.memory_space<vmem>>, %arg10: memref<8x128xbf16, #tpu.memory_space<vmem>>, %arg11: memref<8x1xf32, #tpu.memory_space<vmem>>, %arg12: memref<8x8xf32, #tpu.memory_space<vmem>>) attributes {dimension_semantics = [#tpu.dimension_semantics<parallel>], iteration_bounds = array<i64: 1>, scalar_prefetch = 0 : i64, scratch_operands = 0 : i64, tpu.core_type = #tpu.core_type<tc>, window_params = [{transform_indices = @transform_0, window_bounds = array<i64: 8, 10>}, {pipeline_mode = #tpu.pipeline_mode<synchronous>, transform_indices = @transform_1, window_bounds = array<i64: 10, 256>}, {pipeline_mode = #tpu.pipeline_mode<synchronous>, transform_indices = @transform_2, window_bounds = array<i64: 1, 256>}, {pipeline_mode = #tpu.pipeline_mode<synchronous>, transform_indices = @transform_3, window_bounds = array<i64: 256, 256>}, {pipeline_mode = #tpu.pipeline_mode<synchronous>, transform_indices = @transform_4, window_bounds = array<i64: 1, 256>}, {pipeline_mode = #tpu.pipeline_mode<synchronous>, transform_indices = @transform_5, window_bounds = array<i64: 256, 128>}, {pipeline_mode = #tpu.pipeline_mode<synchronous>, transform_indices = @transform_6, window_bounds = array<i64: 1, 128>}, {pipeline_mode = #tpu.pipeline_mode<synchronous>, transform_indices = @transform_7, window_bounds = array<i64: 128, 128>}, {pipeline_mode = #tpu.pipeline_mode<synchronous>, transform_indices = @transform_8, window_bounds = array<i64: 1, 128>}, {pipeline_mode = #tpu.pipeline_mode<synchronous>, transform_indices = @transform_9, window_bounds = array<i64: 8, 128>}, {pipeline_mode = #tpu.pipeline_mode<synchronous>, transform_indices = @transform_10, window_bounds = array<i64: 8, 1>}, {transform_indices = @transform_11, window_bounds = array<i64: 8, 8>}]} {
    %c0 = arith.constant 0 : index
    %c0_0 = arith.constant 0 : index
    %0 = vector.load %arg1[%c0, %c0_0] : memref<8x10xf32, #tpu.memory_space<vmem>>, vector<8x10xf32>
    %1 = arith.truncf %0 : vector<8x10xf32> to vector<8x10xbf16>
    %c0_1 = arith.constant 0 : index
    %c0_2 = arith.constant 0 : index
    %2 = vector.load %arg2[%c0_1, %c0_2] : memref<10x256xbf16, #tpu.memory_space<vmem>>, vector<10x256xbf16>
    %cst = arith.constant dense<0.000000e+00> : vector<8x256xf32>
    %3 = tpu.matmul %1, %2, %cst {dimension_numbers = #tpu.dot_dimension_numbers<[1], [0], [0], [1], [0, 0, 1, 1], [], []>} : vector<8x10xbf16>, vector<10x256xbf16>, vector<8x256xf32> -> vector<8x256xf32>
    %c0_3 = arith.constant 0 : index
    %c0_4 = arith.constant 0 : index
    %4 = vector.load %arg3[%c0_3, %c0_4] : memref<1x256xf32, #tpu.memory_space<vmem>>, vector<1x256xf32>
    %5 = vector.broadcast %4 : vector<1x256xf32> to vector<8x256xf32>
    %6 = arith.addf %3, %5 : vector<8x256xf32>
    %cst_5 = arith.constant 0.000000e+00 : f32
    %7 = vector.broadcast %cst_5 : f32 to vector<8x256xf32>
    %8 = arith.maximumf %6, %7 : vector<8x256xf32>
    %9 = arith.truncf %8 : vector<8x256xf32> to vector<8x256xbf16>
    %c0_6 = arith.constant 0 : index
    %c0_7 = arith.constant 0 : index
    %10 = vector.load %arg4[%c0_6, %c0_7] : memref<256x256xbf16, #tpu.memory_space<vmem>>, vector<256x256xbf16>
    %cst_8 = arith.constant dense<0.000000e+00> : vector<8x256xf32>
    %11 = tpu.matmul %9, %10, %cst_8 {dimension_numbers = #tpu.dot_dimension_numbers<[1], [0], [0], [1], [0, 0, 1, 1], [], []>} : vector<8x256xbf16>, vector<256x256xbf16>, vector<8x256xf32> -> vector<8x256xf32>
    %c0_9 = arith.constant 0 : index
    %c0_10 = arith.constant 0 : index
    %12 = vector.load %arg5[%c0_9, %c0_10] : memref<1x256xf32, #tpu.memory_space<vmem>>, vector<1x256xf32>
    %13 = vector.broadcast %12 : vector<1x256xf32> to vector<8x256xf32>
    %14 = arith.addf %11, %13 : vector<8x256xf32>
    %cst_11 = arith.constant 0.000000e+00 : f32
    %15 = vector.broadcast %cst_11 : f32 to vector<8x256xf32>
    %16 = arith.maximumf %14, %15 : vector<8x256xf32>
    %17 = arith.truncf %16 : vector<8x256xf32> to vector<8x256xbf16>
    %c0_12 = arith.constant 0 : index
    %c0_13 = arith.constant 0 : index
    %18 = vector.load %arg6[%c0_12, %c0_13] : memref<256x128xbf16, #tpu.memory_space<vmem>>, vector<256x128xbf16>
    %cst_14 = arith.constant dense<0.000000e+00> : vector<8x128xf32>
    %19 = tpu.matmul %17, %18, %cst_14 {dimension_numbers = #tpu.dot_dimension_numbers<[1], [0], [0], [1], [0, 0, 1, 1], [], []>} : vector<8x256xbf16>, vector<256x128xbf16>, vector<8x128xf32> -> vector<8x128xf32>
    %c0_15 = arith.constant 0 : index
    %c0_16 = arith.constant 0 : index
    %20 = vector.load %arg7[%c0_15, %c0_16] : memref<1x128xf32, #tpu.memory_space<vmem>>, vector<1x128xf32>
    %21 = vector.broadcast %20 : vector<1x128xf32> to vector<8x128xf32>
    %22 = arith.addf %19, %21 : vector<8x128xf32>
    %cst_17 = arith.constant 0.000000e+00 : f32
    %23 = vector.broadcast %cst_17 : f32 to vector<8x128xf32>
    %24 = arith.maximumf %22, %23 : vector<8x128xf32>
    %25 = arith.truncf %24 : vector<8x128xf32> to vector<8x128xbf16>
    %c0_18 = arith.constant 0 : index
    %c0_19 = arith.constant 0 : index
    %26 = vector.load %arg8[%c0_18, %c0_19] : memref<128x128xbf16, #tpu.memory_space<vmem>>, vector<128x128xbf16>
    %cst_20 = arith.constant dense<0.000000e+00> : vector<8x128xf32>
    %27 = tpu.matmul %25, %26, %cst_20 {dimension_numbers = #tpu.dot_dimension_numbers<[1], [0], [0], [1], [0, 0, 1, 1], [], []>} : vector<8x128xbf16>, vector<128x128xbf16>, vector<8x128xf32> -> vector<8x128xf32>
    %c0_21 = arith.constant 0 : index
    %c0_22 = arith.constant 0 : index
    %28 = vector.load %arg9[%c0_21, %c0_22] : memref<1x128xf32, #tpu.memory_space<vmem>>, vector<1x128xf32>
    %29 = vector.broadcast %28 : vector<1x128xf32> to vector<8x128xf32>
    %30 = arith.addf %27, %29 : vector<8x128xf32>
    %cst_23 = arith.constant 0.000000e+00 : f32
    %31 = vector.broadcast %cst_23 : f32 to vector<8x128xf32>
    %32 = arith.maximumf %30, %31 : vector<8x128xf32>
    %33 = arith.truncf %32 : vector<8x128xf32> to vector<8x128xbf16>
    %c0_24 = arith.constant 0 : index
    %c0_25 = arith.constant 0 : index
    %34 = vector.load %arg10[%c0_24, %c0_25] : memref<8x128xbf16, #tpu.memory_space<vmem>>, vector<8x128xbf16>
    %cst_26 = arith.constant dense<0.000000e+00> : vector<8x8xf32>
    %35 = tpu.matmul %34, %33, %cst_26 {dimension_numbers = #tpu.dot_dimension_numbers<[1], [1], [0], [0], [0, 0, 1, 0], [], []>} : vector<8x128xbf16>, vector<8x128xbf16>, vector<8x8xf32> -> vector<8x8xf32>
    %c0_27 = arith.constant 0 : index
    %c0_28 = arith.constant 0 : index
    %36 = vector.load %arg11[%c0_27, %c0_28] : memref<8x1xf32, #tpu.memory_space<vmem>>, vector<8x1xf32>
    %37 = vector.broadcast %36 : vector<8x1xf32> to vector<8x8xf32>
    %38 = arith.addf %35, %37 : vector<8x8xf32>
    %c0_29 = arith.constant 0 : index
    %c0_30 = arith.constant 0 : index
    %39 = vector.load %arg12[%c0_29, %c0_30] : memref<8x8xf32, #tpu.memory_space<vmem>>, vector<8x8xf32>
    tpu.vector_store %arg12[%c0_29, %c0_30], %38 {strides = array<i32>} : memref<8x8xf32, #tpu.memory_space<vmem>>, vector<8x8xf32>,
    return
  }
  func.func @transform_0(%arg0: i32) -> (i32, i32) {
    %c0_i32 = arith.constant 0 : i32
    %c0_i32_0 = arith.constant 0 : i32
    return %arg0, %c0_i32 : i32, i32
  }
  func.func @transform_1(%arg0: i32) -> (i32, i32) {
    %c0_i32 = arith.constant 0 : i32
    %c0_i32_0 = arith.constant 0 : i32
    %c0_i32_1 = arith.constant 0 : i32
    return %c0_i32, %c0_i32_0 : i32, i32
  }
  func.func @transform_2(%arg0: i32) -> (i32, i32) {
    %c0_i32 = arith.constant 0 : i32
    %c0_i32_0 = arith.constant 0 : i32
    %c0_i32_1 = arith.constant 0 : i32
    return %c0_i32, %c0_i32_0 : i32, i32
  }
  func.func @transform_3(%arg0: i32) -> (i32, i32) {
    %c0_i32 = arith.constant 0 : i32
    %c0_i32_0 = arith.constant 0 : i32
    %c0_i32_1 = arith.constant 0 : i32
    return %c0_i32, %c0_i32_0 : i32, i32
  }
  func.func @transform_4(%arg0: i32) -> (i32, i32) {
    %c0_i32 = arith.constant 0 : i32
    %c0_i32_0 = arith.constant 0 : i32
    %c0_i32_1 = arith.constant 0 : i32
    return %c0_i32, %c0_i32_0 : i32, i32
  }
  func.func @transform_5(%arg0: i32) -> (i32, i32) {
    %c0_i32 = arith.constant 0 : i32
    %c0_i32_0 = arith.constant 0 : i32
    %c0_i32_1 = arith.constant 0 : i32
    return %c0_i32, %c0_i32_0 : i32, i32
  }
  func.func @transform_6(%arg0: i32) -> (i32, i32) {
    %c0_i32 = arith.constant 0 : i32
    %c0_i32_0 = arith.constant 0 : i32
    %c0_i32_1 = arith.constant 0 : i32
    return %c0_i32, %c0_i32_0 : i32, i32
  }
  func.func @transform_7(%arg0: i32) -> (i32, i32) {
    %c0_i32 = arith.constant 0 : i32
    %c0_i32_0 = arith.constant 0 : i32
    %c0_i32_1 = arith.constant 0 : i32
    return %c0_i32, %c0_i32_0 : i32, i32
  }
  func.func @transform_8(%arg0: i32) -> (i32, i32) {
    %c0_i32 = arith.constant 0 : i32
    %c0_i32_0 = arith.constant 0 : i32
    %c0_i32_1 = arith.constant 0 : i32
    return %c0_i32, %c0_i32_0 : i32, i32
  }
  func.func @transform_9(%arg0: i32) -> (i32, i32) {
    %c0_i32 = arith.constant 0 : i32
    %c0_i32_0 = arith.constant 0 : i32
    %c0_i32_1 = arith.constant 0 : i32
    return %c0_i32, %c0_i32_0 : i32, i32
  }
  func.func @transform_10(%arg0: i32) -> (i32, i32) {
    %c0_i32 = arith.constant 0 : i32
    %c0_i32_0 = arith.constant 0 : i32
    %c0_i32_1 = arith.constant 0 : i32
    return %c0_i32, %c0_i32_0 : i32, i32
  }
  func.func @transform_11(%arg0: i32) -> (i32, i32) {
    %c0_i32 = arith.constant 0 : i32
    %c0_i32_0 = arith.constant 0 : i32
    return %c0_i32, %arg0 : i32, i32
  }
}

</mosaic_0001>

<bundles_post_ra>
// kernel: tpu_custom_call.1
= control target key start
LH: loop header
LB: loop body
LE: loop exit
PB: predicated region body
PF: predicated region fallthrough
CT: control target
= control target key end

     0   :  { %16 = vsyncpa [#allocation3], 0  ;;  %s1244_s0 = inlined_call_operand.vmem [shape: f32[8,10], index: 0, kind: input, shape index: {}]   ;;  %s1245_s1 = inlined_call_operand.hbm [shape: bf16[10,256], index: 1, kind: input, shape index: {}]   ;;  %s1246_s2 = inlined_call_operand.hbm [shape: f32[1,256], index: 2, kind: input, shape index: {}]   ;;  %s1247_s3 = inlined_call_operand.hbm [shape: bf16[256,256], index: 3, kind: input, shape index: {}]   ;;  %s1248_s4 = inlined_call_operand.vmem [shape: f32[1,256], index: 4, kind: input, shape index: {}]   ;;  %s1249_s5 = inlined_call_operand.hbm [shape: bf16[256,128], index: 5, kind: input, shape index: {}]   ;;  %s1250_s6 = inlined_call_operand.vmem [shape: f32[1,128], index: 6, kind: input, shape index: {}]   ;;  %s1251_s7 = inlined_call_operand.hbm [shape: bf16[128,128], index: 7, kind: input, shape index: {}]   ;;  %s1252_s8 = inlined_call_operand.vmem [shape: f32[1,128], index: 8, kind: input, shape index: {}]   ;;  %s1253_s9 = inlined_call_operand.vmem [shape: bf16[8,128], index: 9, kind: input, shape index: {}]   ;;  %s1254_s10 = inlined_call_operand.vmem [shape: f32[8,1], index: 10, kind: input, shape index: {}]   ;;  %s1255_s11 = inlined_call_operand.hbm [shape: f32[8,8], index: 11, kind: output, shape index: {}]  }
   0x1   :  { %17 = vsyncpa [#allocation6], 0 }
   0x2   :  { %18 = vsyncpa [#allocation9], 0 }
   0x3   :  { %19 = vsyncpa [#allocation4], 0  ;;  %s1129_s17 = smov [#allocation5]   ;;  %s1130_s19 = smov [#allocation8]  }
   0x4   :  { %s40_s18 = sshll.u32 %s1129_s17, 4  ;;  %s63_s20 = sshll.u32 %s1130_s19, 4  ;;  %s41_s18 = int_to_ptr.vmem [resolvable:$true] %s40_s18  ;;  %s64_s20 = int_to_ptr.vmem [resolvable:$true] %s63_s20 }
   0x5   :  { %s1009_s21 = scalar_lea.vmem %s41_s18, 32  ;;  %p1014_p1 = scmp.lt.s32.totalorder %s41_s18, %s41_s18 }
   0x6   :  { %p1010_p0 = scmp.ne.s32.totalorder %s41_s18, %s1009_s21  ;;  %p1015_p2 = scmp.lt.s32.totalorder %s1009_s21, %s1009_s21 }
   0x8   :  { %p1016_p3 = por %p1015_p2, %p1014_p1 }
   0xa   :  { %p1017_p4 = pnand %p1016_p3, %p1010_p0 }
   0xc   :  { %1020 = shalt.err (!%p1017_p4)
}
   0xd   :  { %43 = dma.hbm_to_vmem [thread:$0]  %s1246_s2, 32, %s41_s18, [#allocation6]  }
   0xe   :  { %s1029_s24 = scalar_lea.vmem %s64_s20, 2048  ;;  %p1034_p6 = scmp.lt.s32.totalorder %s64_s20, %s64_s20 }
   0xf   :  { %p1030_p5 = scmp.ne.s32.totalorder %s64_s20, %s1029_s24  ;;  %p1035_p7 = scmp.lt.s32.totalorder %s1029_s24, %s1029_s24 }
  0x11   :  { %p1036_p8 = por %p1035_p7, %p1034_p6 }
  0x13   :  { %p1037_p9 = pnand %p1036_p8, %p1030_p5 }
  0x15   :  { %1040 = shalt.err (!%p1037_p9)
}
  0x16   :  { %s1131_s25 = smov 64   ;;  %s1132_s26 = smov 4  }
  0x17   :  { %69 = dma.hbm_to_vmem [thread:$0]  %s1249_s5, 2048, %s64_s20, [#allocation9], %s1131_s25, %s1131_s25, %s1132_s26  }
  0x18   :  { %s1133_s29 = smov [#allocation2]  }
  0x19   :  { %s27_s30 = sshll.u32 %s1133_s29, 4  ;;  %s28_s30 = int_to_ptr.vmem [resolvable:$true] %s27_s30 }
  0x1a   :  { %s1049_s2 = scalar_lea.vmem %s28_s30, 256  ;;  %p1054_p11 = scmp.lt.s32.totalorder %s28_s30, %s28_s30 }
  0x1b   :  { %p1050_p10 = scmp.ne.s32.totalorder %s28_s30, %s1049_s2  ;;  %p1055_p12 = scmp.lt.s32.totalorder %s1049_s2, %s1049_s2 }
  0x1d   :  { %p1056_p13 = por %p1055_p12, %p1054_p11 }
  0x1f   :  { %p1057_p0 = pnand %p1056_p13, %p1050_p10 }
  0x21   :  { %1060 = shalt.err (!%p1057_p0)
}
  0x22   :  { %s1134_s12 = smov 128   ;;  %s1135_s13 = smov 8  }
  0x23   :  { %33 = dma.hbm_to_vmem [thread:$0]  %s1245_s1, 256, %s28_s30, [#allocation3], %s1134_s12, %s1134_s12, %s1135_s13  }
  0x24   :  { %s1136_s16 = smov [#allocation7]   ;;  %s1137_s5 = smov [#allocation10]  }
  0x25   :  { %s49_s17 = sshll.u32 %s1136_s16, 4  ;;  %s77_s18 = sshll.u32 %s1137_s5, 4  ;;  %s50_s17 = int_to_ptr.vmem [resolvable:$true] %s49_s17  ;;  %s78_s18 = int_to_ptr.vmem [resolvable:$true] %s77_s18 }
  0x26   :  { %s1069_s19 = scalar_lea.vmem %s50_s17, 4096  ;;  %p1074_p2 = scmp.lt.s32.totalorder %s50_s17, %s50_s17 }
  0x27   :  { %p1070_p1 = scmp.ne.s32.totalorder %s50_s17, %s1069_s19  ;;  %p1075_p3 = scmp.lt.s32.totalorder %s1069_s19, %s1069_s19 }
  0x29   :  { %p1076_p4 = por %p1075_p3, %p1074_p2 }
  0x2b   :  { %p1077_p5 = pnand %p1076_p4, %p1070_p1 }
  0x2d   :  { %1080 = shalt.err (!%p1077_p5)
}
  0x2e   :  { %55 = dma.hbm_to_vmem [thread:$0]  %s1247_s3, 4096, %s50_s17, [#allocation6], %s1134_s12, %s1134_s12, %s1135_s13  }
  0x2f   :  { %s1089_s22 = scalar_lea.vmem %s78_s18, 1024  ;;  %p1094_p7 = scmp.lt.s32.totalorder %s78_s18, %s78_s18 }
  0x30   :  { %p1090_p6 = scmp.ne.s32.totalorder %s78_s18, %s1089_s22  ;;  %p1095_p8 = scmp.lt.s32.totalorder %s1089_s22, %s1089_s22 }
  0x32   :  { %p1096_p9 = por %p1095_p8, %p1094_p7 }
  0x34   :  { %p1097_p10 = pnand %p1096_p9, %p1090_p6 }
  0x36   :  { %1100 = shalt.err (!%p1097_p10)
}
  0x37   :  { %83 = dma.hbm_to_vmem [thread:$0]  %s1251_s7, 1024, %s78_s18, [#allocation9], %s1131_s25, %s1131_s25, %s1132_s26  }
  0x38   :  { %1121 = dma.done.wait [#allocation3], 256  }
  0x39   :  { %1122 = vsyncadd [#allocation3], 4294967040 }
  0x3a   :  { %1123 = dma.done.wait [#allocation6], 4128  }
  0x3b   :  { %1124 = vsyncadd [#allocation6], 4294963168 }
  0x3c   :  { %1125 = dma.done.wait [#allocation9], 3072  }
  0x3d   :  { %1126 = vsyncadd [#allocation9], 4294964224  ;;  %v1138_v0 = vmov 0   ;;  %vm134_vm0 = vcmask 1044480   ;;  %v106_v3 = vld [vmem:[%s1244_s0] sm:$0xff]  ;;  %vm130_vm1 = vcmask 80896   ;;  %v112_v50 = vlaneseq }
  0x3e   :  { %173 = vmatprep.mubr.bf16.mxu0 %v1138_v0  ;;  %925 = vset.pattern.permute.xlu0 %v1138_v0  ;;  %v926_v1 = vld [vmem:[#allocation2 + $0x4] ss:$8 sps:$4 sm:$0x1f]   ;;  %v928_v2 = vld [vmem:[#allocation2] ss:$8 sps:$4 sm:$0x1f]   ;;  %v107_v7 = vpack.c.bf16 %v106_v3, %v106_v3 }
  0x3f   :  { %793 = vmatprep.subr.msk.bf16.mxu0 %vm134_vm0, %v926_v1  ;;  %v929_v4 = vld [vmem:[#allocation7 + $0x74] ss:$8 sps:$4 sm:$0xff]   ;;  %v931_v5 = vld [vmem:[#allocation7 + $0x70] ss:$8 sps:$4 sm:$0xff]   ;;  %v136_v6 = vsel %vm134_vm0, %v928_v2, 0  ;;  %v981_v42 = vld [vmem:[#allocation8 + $0x68] sm:$0xff]  }
  0x40   :  { %v932_v8 = vld [vmem:[#allocation7 + $0x64] ss:$8 sps:$4 sm:$0xff]   ;;  %156 = vmatpush1.bf16.msra.mxu0 %v136_v6  ;;  %390 = vmatprep.subr.bf16.mxu1 %v929_v4  ;;  %v934_v9 = vld [vmem:[#allocation7 + $0x60] ss:$8 sps:$4 sm:$0xff]   ;;  %v935_v10 = vld [vmem:[#allocation7 + $0x54] ss:$8 sps:$4 sm:$0xff]  }
  0x41   :  { %391 = vmatpush1.bf16.msra.mxu1 %v931_v5  ;;  %v937_v11 = vld [vmem:[#allocation7 + $0x50] ss:$8 sps:$4 sm:$0xff]   ;;  %v938_v12 = vld [vmem:[#allocation7 + $0x44] ss:$8 sps:$4 sm:$0xff]   ;;  %v940_v13 = vld [vmem:[#allocation7 + $0x40] ss:$8 sps:$4 sm:$0xff]  }
  0x42   :  { %392 = vmatprep.subr.bf16.mxu1 %v932_v8  ;;  %v941_v14 = vld [vmem:[#allocation7 + $0x34] ss:$8 sps:$4 sm:$0xff]   ;;  %v943_v15 = vld [vmem:[#allocation7 + $0x30] ss:$8 sps:$4 sm:$0xff]   ;;  %v944_v16 = vld [vmem:[#allocation7 + $0x24] ss:$8 sps:$4 sm:$0xff]  }
  0x43   :  { %794 = vmatmul.mubr.msk.bf16.vlgmr.msra.gmra.mxu0 %vm130_vm1, %v107_v7  ;;  %v946_v17 = vld [vmem:[#allocation7 + $0x20] ss:$8 sps:$4 sm:$0xff]   ;;  %v947_v18 = vld [vmem:[#allocation7 + $0x14] ss:$8 sps:$4 sm:$0xff]   ;;  %v949_v19 = vld [vmem:[#allocation7 + $0x10] ss:$8 sps:$4 sm:$0xff]  }
  0x44   :  { %v950_v20 = vld [vmem:[#allocation7 + $0x4] ss:$8 sps:$4 sm:$0xff]   ;;  %v952_v21 = vld [vmem:[#allocation7] ss:$8 sps:$4 sm:$0xff]   ;;  %v953_v22 = vld [vmem:[#allocation7 + $0xf4] ss:$8 sps:$4 sm:$0xff]  }
  0x45   :  { %393 = vmatpush1.bf16.msra.mxu1 %v934_v9  ;;  %v955_v23 = vld [vmem:[#allocation7 + $0xf0] ss:$8 sps:$4 sm:$0xff]   ;;  %v956_v24 = vld [vmem:[#allocation7 + $0xe4] ss:$8 sps:$4 sm:$0xff]   ;;  %v958_v25 = vld [vmem:[#allocation7 + $0xe0] ss:$8 sps:$4 sm:$0xff]  }
  0x46   :  { %394 = vmatprep.subr.bf16.mxu1 %v935_v10  ;;  %v959_v26 = vld [vmem:[#allocation7 + $0xd4] ss:$8 sps:$4 sm:$0xff]   ;;  %v961_v27 = vld [vmem:[#allocation7 + $0xd0] ss:$8 sps:$4 sm:$0xff]   ;;  %v962_v28 = vld [vmem:[#allocation7 + $0xc4] ss:$8 sps:$4 sm:$0xff]  }
  0x47   :  { %v964_v29 = vld [vmem:[#allocation7 + $0xc0] ss:$8 sps:$4 sm:$0xff]   ;;  %v965_v30 = vld [vmem:[#allocation7 + $0xb4] ss:$8 sps:$4 sm:$0xff]   ;;  %v967_v31 = vld [vmem:[#allocation7 + $0xb0] ss:$8 sps:$4 sm:$0xff]  }
  0x48   :  { %v968_v32 = vld [vmem:[#allocation7 + $0xa4] ss:$8 sps:$4 sm:$0xff]   ;;  %v970_v33 = vld [vmem:[#allocation7 + $0xa0] ss:$8 sps:$4 sm:$0xff]   ;;  %v971_v34 = vld [vmem:[#allocation7 + $0x94] ss:$8 sps:$4 sm:$0xff]  }
  0x49   :  { %395 = vmatpush1.bf16.msra.mxu1 %v937_v11  ;;  %v973_v35 = vld [vmem:[#allocation7 + $0x90] ss:$8 sps:$4 sm:$0xff]   ;;  %v974_v36 = vld [vmem:[#allocation7 + $0x84] ss:$8 sps:$4 sm:$0xff]   ;;  %v976_v37 = vld [vmem:[#allocation7 + $0x80] ss:$8 sps:$4 sm:$0xff]  }
  0x4a   :  { %396 = vmatprep.subr.bf16.mxu1 %v938_v12  ;;  %v977_v38 = vld [vmem:[#allocation8 + $0x78] sm:$0xff]   ;;  %v979_v40 = vld [vmem:[#allocation8 + $0x70] sm:$0xff]   ;;  %v982_v43 = vld [vmem:[#allocation8 + $0x28] sm:$0xff]   ;;  %v113_v51 = vshrl.u32 %v112_v50, 7  ;;  %v1139_v7 = vmov 0.0   ;;  %vm1140_vm2 = vmmov 0  }
  0x4b   :  { %v978_v39 = vld [vmem:[#allocation8 + $0x38] sm:$0xff]   ;;  %853 = vmatprep.subr.bf16.mxu0 %v977_v38  ;;  %v980_v41 = vld [vmem:[#allocation8 + $0x30] sm:$0xff]   ;;  %v983_v44 = vld [vmem:[#allocation8 + $0x60] sm:$0xff]   ;;  %vm772_vm3 = vcmask 64512  }
  0x4c   :  { %854 = vmatpush3.bf16.msra.mxu0 %v978_v39  ;;  %v984_v45 = vld [vmem:[#allocation8 + $0x20] sm:$0xff]   ;;  %v985_v46 = vld [vmem:[#allocation8 + $0x58] sm:$0xff]   ;;  %v987_v48 = vld [vmem:[#allocation8 + $0x50] sm:$0xff]   ;;  %v114_v52 = vsub.s32 0, %v113_v51  ;;  %v118_v54 = vsub.s32 1, %v113_v51 }
  0x4d   :  { %397 = vmatpush1.bf16.msra.mxu1 %v940_v13  ;;  %855 = vmatprep.subr.bf16.mxu0 %v979_v40  ;;  %v986_v47 = vld [vmem:[#allocation8 + $0x18] sm:$0xff]   ;;  %v988_v49 = vld [vmem:[#allocation8 + $0x10] sm:$0xff]   ;;  %v989_v3 = vld [vmem:[#allocation8 + $0x48] sm:$0xff]  }
  0x4e   :  { %398 = vmatprep.subr.bf16.mxu1 %v941_v14  ;;  %v110_v53 = vld [vmem:[#allocation5] sm:$0x3]  ;;  %v990_v4 = vld [vmem:[#allocation8 + $0x8] sm:$0xff]   ;;  %v991_v5 = vld [vmem:[#allocation8 + $0x40] sm:$0xff]  }
  0x4f   :  { %v115_v55 = vrot.slane %v110_v53, %v114_v52  ;;  %v119_v56 = vrot.slane %v110_v53, %v118_v54  ;;  %v992_v6 = vld [vmem:[#allocation8] sm:$0xff]   ;;  %v218_v8 = vld [vmem:[%s1248_s4] sm:$0x3] }
  0x50   :  { %856 = vmatpush3.bf16.msra.mxu0 %v980_v41  ;;  %v223_v9 = vrot.slane %v218_v8, %v114_v52  ;;  %v227_v10 = vrot.slane %v218_v8, %v118_v54  ;;  %v726_v38 = vld [vmem:[%s1254_s10] sm:$0xff]  ;;  %s1141_s10 = smov [#allocation11]  }
  0x51   :  { %399 = vmatpush1.bf16.msra.mxu1 %v943_v15  ;;  %857 = vmatprep.subr.bf16.mxu0 %v981_v42  ;;  %v844_v39 = vld [vmem:[%s1252_s8] ss:$0 sm:$0xff]  ;;  %s780_s2 = sshll.u32 %s1141_s10, 4  ;;  %s781_s2 = int_to_ptr.vmem [resolvable:$true] %s780_s2 }
  0x52   :  { %400 = vmatprep.subr.bf16.mxu1 %v944_v16  ;;  %729 = vperm.xlu0 %925, %v726_v38   ;;  %s1101_s8 = scalar_lea.vmem %s781_s2, 128  ;;  %p1106_p12 = scmp.lt.s32.totalorder %s781_s2, %s781_s2 }
  0x53   :  { %p1102_p11 = scmp.ne.s32.totalorder %s781_s2, %s1101_s8  ;;  %p1107_p13 = scmp.lt.s32.totalorder %s1101_s8, %s1101_s8 }
  0x54   :  { %858 = vmatpush3.bf16.msra.mxu0 %v982_v43 }
  0x55   :  { %401 = vmatpush1.bf16.msra.mxu1 %v946_v17  ;;  %859 = vmatprep.subr.bf16.mxu0 %v983_v44  ;;  %p1108_p0 = por %p1107_p13, %p1106_p12 }
  0x56   :  { %402 = vmatprep.subr.bf16.mxu1 %v947_v18 }
  0x57   :  { %p1109_p1 = pnand %p1108_p0, %p1102_p11 }
  0x58   :  { %860 = vmatpush3.bf16.msra.mxu0 %v984_v45 }
  0x59   :  { %403 = vmatpush1.bf16.msra.mxu1 %v949_v19  ;;  %861 = vmatprep.subr.bf16.mxu0 %v985_v46 }
  0x5a   :  { %404 = vmatprep.subr.bf16.mxu1 %v950_v20  ;;  %v993_v20 = vld [vmem:[#allocation10 + $0x38] sm:$0xff]  }
  0x5c   :  { %862 = vmatpush3.bf16.msra.mxu0 %v986_v47  ;;  %v725_v47 = vld [vmem:[%s1253_s9] sm:$0xf] }
  0x5d   :  { %405 = vmatpush1.bf16.msra.mxu1 %v952_v21  ;;  %863 = vmatprep.subr.bf16.mxu0 %v987_v48 }
  0x5e   :  { %406 = vmatprep.subr.bf16.mxu1 %v953_v22  ;;  %v994_v22 = vld [vmem:[#allocation10 + $0x30] sm:$0xff]  }
  0x60   :  { %864 = vmatpush3.bf16.msra.mxu0 %v988_v49 }
  0x61   :  { %407 = vmatpush2.bf16.msra.mxu1 %v955_v23  ;;  %865 = vmatprep.subr.bf16.mxu0 %v989_v3  ;;  %v995_v23 = vld [vmem:[#allocation10 + $0x28] sm:$0xff]  }
  0x62   :  { %408 = vmatprep.subr.bf16.mxu1 %v956_v24  ;;  %v996_v24 = vld [vmem:[#allocation10 + $0x20] sm:$0xff]  }
  0x64   :  { %866 = vmatpush3.bf16.msra.mxu0 %v990_v4 }
  0x65   :  { %409 = vmatpush2.bf16.msra.mxu1 %v958_v25  ;;  %867 = vmatprep.subr.bf16.mxu0 %v991_v5  ;;  %v997_v25 = vld [vmem:[#allocation10 + $0x18] sm:$0xff]  }
  0x66   :  { %410 = vmatprep.subr.bf16.mxu1 %v959_v26  ;;  %v998_v26 = vld [vmem:[#allocation10 + $0x10] sm:$0xff]  }
  0x68   :  { %868 = vmatpush3.bf16.msra.mxu0 %v992_v6 }
  0x69   :  { %411 = vmatpush2.bf16.msra.mxu1 %v961_v27  ;;  %886 = vmatprep.subr.bf16.mxu0 %v1139_v7  ;;  %v999_v27 = vld [vmem:[#allocation10 + $0x8] sm:$0xff]  }
  0x6a   :  { %412 = vmatprep.subr.bf16.mxu1 %v962_v28  ;;  %v1000_v28 = vld [vmem:[#allocation10] sm:$0xff]  }
  0x6d   :  { %413 = vmatpush2.bf16.msra.mxu1 %v964_v29 }
  0x6e   :  { %414 = vmatprep.subr.bf16.mxu1 %v965_v30  ;;  %v827_v30 = vld [vmem:[%s1250_s6] ss:$0 sm:$0xff] }
  0x71   :  { %415 = vmatpush2.bf16.msra.mxu1 %v967_v31 }
  0x72   :  { %416 = vmatprep.subr.bf16.mxu1 %v968_v32 }
  0x75   :  { %417 = vmatpush2.bf16.msra.mxu1 %v970_v33 }
  0x76   :  { %418 = vmatprep.subr.bf16.mxu1 %v971_v34 }
  0x79   :  { %419 = vmatpush2.bf16.msra.mxu1 %v973_v35 }
  0x7a   :  { %420 = vmatprep.subr.bf16.mxu1 %v974_v36 }
  0x7d   :  { %421 = vmatpush2.bf16.msra.mxu1 %v976_v37 }
  0x7e   :  { %906 = vmatprep.subr.bf16.mxu1 %v1139_v7 }
  0xcd   :  { %v730_v48 = vpop.permute.xlu0 %729 }
 0x103   :  { %v175_v57 = vpop.f32.mrf.mxu0 }
 0x104   :  { %v176_v58 = vadd.f32 %v175_v57, %v115_v55 }
 0x105   :  { %v177_v59 = vpop.f32.mrf.mxu0 }
 0x106   :  { %v178_v60 = vadd.f32 %v177_v59, %v119_v56  ;;  %v182_v61 = vmax.f32 %v176_v58, 0.0 }
 0x107   :  { %v179_v62 = vpop.f32.mrf.mxu0 }
 0x108   :  { %v183_v63 = vmax.f32 %v178_v60, 0.0  ;;  %v184_v2 = vpack.c.bf16 %v182_v61, %v182_v61 }
 0x109   :  { %v180_v0 = vpop.f32.mrf.mxu0 }
 0x10a   :  { %v185_v1 = vpack.c.bf16 %v183_v63, %v183_v63 }
 0x10c   :  { %422 = vmatprep.mubr.bf16.mxu1 %v185_v1 }
 0x10d   :  { %423 = vmatmul.mubr.bf16.vlgmr.msra.gmra.mxu1 %v184_v2 }
 0x10e   :  { %908 = vmatprep.mubr.msk.bf16.mxu1 %vm1140_vm2, %v1139_v7 }
 0x1cd   :  { %v424_v11 = vpop.f32.mrf.mxu1 }
 0x1ce   :  { %v425_v12 = vadd.f32 %v424_v11, %v223_v9 }
 0x1cf   :  { %v426_v13 = vpop.f32.mrf.mxu1 }
 0x1d0   :  { %v427_v14 = vadd.f32 %v426_v13, %v227_v10  ;;  %v431_v15 = vmax.f32 %v425_v12, 0.0 }
 0x1d1   :  { %v428_v16 = vpop.f32.mrf.mxu1 }
 0x1d2   :  { %v432_v17 = vmax.f32 %v427_v14, 0.0  ;;  %v433_v21 = vpack.c.bf16 %v431_v15, %v431_v15 }
 0x1d3   :  { %v429_v18 = vpop.f32.mrf.mxu1 }
 0x1d4   :  { %v434_v19 = vpack.c.bf16 %v432_v17, %v432_v17 }
 0x1d6   :  { %602 = vmatprep.mubr.bf16.mxu0 %v434_v19 }
 0x1d7   :  { %603 = vmatmul.mubr.bf16.vlgmr.msra.gmra.mxu0 %v433_v21 }
 0x1d8   :  { %887 = vmatpush3.bf16.msra.mxu0 %v993_v20  ;;  %902 = vmatprep.mubr.msk.bf16.mxu0 %vm1140_vm2, %v1139_v7 }
 0x1d9   :  { %888 = vmatprep.subr.bf16.mxu0 %v1139_v7 }
 0x1dc   :  { %889 = vmatpush3.bf16.msra.mxu0 %v994_v22 }
 0x1dd   :  { %890 = vmatprep.subr.bf16.mxu0 %v1139_v7 }
 0x1e0   :  { %891 = vmatpush3.bf16.msra.mxu0 %v995_v23 }
 0x1e1   :  { %892 = vmatprep.subr.bf16.mxu0 %v1139_v7 }
 0x1e4   :  { %893 = vmatpush3.bf16.msra.mxu0 %v996_v24 }
 0x1e5   :  { %894 = vmatprep.subr.bf16.mxu0 %v1139_v7 }
 0x1e8   :  { %895 = vmatpush3.bf16.msra.mxu0 %v997_v25 }
 0x1e9   :  { %896 = vmatprep.subr.bf16.mxu0 %v1139_v7 }
 0x1ec   :  { %897 = vmatpush3.bf16.msra.mxu0 %v998_v26 }
 0x1ed   :  { %898 = vmatprep.subr.bf16.mxu0 %v1139_v7 }
 0x1f0   :  { %899 = vmatpush3.bf16.msra.mxu0 %v999_v27 }
 0x1f1   :  { %900 = vmatprep.subr.bf16.mxu0 %v1139_v7 }
 0x1f4   :  { %901 = vmatpush3.bf16.msra.mxu0 %v1000_v28 }
 0x297   :  { %v869_v29 = vpop.f32.mrf.mxu0 }
 0x299   :  { %v870_v31 = vpop.f32.mrf.mxu0 }
 0x29a   :  { %v871_v32 = vadd.f32 %v870_v31, %v869_v29 }
 0x29b   :  { %v872_v33 = vpop.f32.mrf.mxu0 }
 0x29c   :  { %v605_v34 = vadd.f32 %v871_v32, %v827_v30 }
 0x29d   :  { %v873_v35 = vpop.f32.mrf.mxu0 }
 0x29e   :  { %v610_v36 = vmax.f32 %v605_v34, 0.0 }
 0x2a0   :  { %v611_v37 = vpack.c.bf16 %v610_v36, %v610_v36 }
 0x2a2   :  { %903 = vmatmul.mubr.bf16.vlgmr.msra.gmra.mxu0 %v611_v37 }
 0x362   :  { %v717_v40 = vpop.f32.mrf.mxu0 }
 0x363   :  { %v718_v41 = vadd.f32 %v844_v39, %v717_v40 }
 0x364   :  { %v904_v42 = vpop.f32.mrf.mxu0 }
 0x365   :  { %v723_v43 = vmax.f32 %v718_v41, 0.0 }
 0x366   :  { %v720_v44 = vpop.f32.mrf.mxu0 }
 0x367   :  { %v724_v45 = vpack.c.bf16 %v723_v43, %v723_v43 }
 0x368   :  { %v905_v46 = vpop.f32.mrf.mxu0 }
 0x369   :  { %907 = vmatpush3.bf16.xpose.msra.mxu1 %v724_v45 }
 0x370   :  { %909 = vmatmul.mubr.bf16.vlgmr.msra.gmra.mxu1 %v725_v47 }
 0x430   :  { %v766_v49 = vpop.f32.mrf.mxu1 }
 0x431   :  { %v767_v50 = vadd.f32 %v766_v49, %v730_v48 }
 0x432   :  { %v910_v51 = vpop.f32.mrf.mxu1 }
 0x433   :  { %773 = vst.msk [vmem:[#allocation11] sm:$0xff] %vm772_vm3, %v767_v50 }
 0x434   :  { %v769_v52 = vpop.f32.mrf.mxu1 }
 0x435   :  { %1112 = shalt.err (!%p1109_p1)
}
 0x436   :  { %783 = dma.vmem_to_hbm [thread:$0]  %s781_s2, 128, %s1255_s11, [#allocation4]   ;;  %v911_v53 = vpop.f32.mrf.mxu1 }
 0x437   :  { %1127 = dma.done.wait [#allocation4], 128  }
 0x438   :  { %1128 = vsyncadd [#allocation4], 4294967168 }
 0x439   :  { %787 = vsyncpa [#allocation3], 1 }
 0x43a   :  { %788 = vsyncpa [#allocation6], 1 }
 0x43b   :  { %789 = vsyncpa [#allocation9], 1 }
 0x43c   :  { %790 = vsyncpa [#allocation4], 1 }

</bundles_post_ra>
